<compile_context>
chip_gen: v7x
topology: tpu7x:2x2x1
jax: 0.10.0
libtpu: 0.0.40
codegen_flags: <defaults>
</compile_context>

<pallas_src>
import functools

import jax
import jax.numpy as jnp
from jax.experimental import pallas as pl
from jax.experimental.pallas import tpu as pltpu

LANES = 128
SUBLANES = 8
CHUNK_ROWS = 256        # rows per in-kernel accumulation chunk (multiple of 8)
PLATEAU_ROWS = 2048     # ~1 MiB f32 per input: HBM-roofline plateau tile
MAX_ROWS = 8192


def _loss_partial_sum_kernel(x_ref, t_ref, lv_ref, out_ref, *,
                             block_rows, chunk_rows, rows_total, ragged):
    """Writes the (8,128) sublane-group partial loss sum of one block."""
    n_chunks = block_rows // chunk_rows
    block_base = pl.program_id(0) * block_rows

    def chunk_sum(c):
        start = c * chunk_rows
        if not isinstance(start, int):
            start = pl.multiple_of(start, chunk_rows)   # aligned dynamic slice
        sl = pl.ds(start, chunk_rows)
        # Compute in f32 regardless of input dtype (v5e VPU/EUP have no bf16).
        x = x_ref[sl, :].astype(jnp.float32)
        t = t_ref[sl, :].astype(jnp.float32)
        lv = lv_ref[sl, :].astype(jnp.float32)
        # Constant 1.4142 (not sqrt(2)) intentionally matches the PyTorch src.
        loss = 1.4142 * jnp.exp(-lv) * jnp.abs(x - t) + lv
        if ragged:
            # Only the last grid block can extend past the array; its OOB rows
            # hold unspecified data -> select them away (select, not multiply,
            # so garbage NaN/Inf cannot leak into the sum).
            row = (block_base + start
                   + jax.lax.broadcasted_iota(jnp.int32, loss.shape, 0))
            loss = jnp.where(row < rows_total, loss, 0.0)
        # (chunk,128) -> (chunk/8, 8, 128), sum over axis 0: pure VPU adds,
        # no per-step cross-lane XLU reduce, lane-dense (8,128) result.
        return loss.reshape(-1, SUBLANES, LANES).sum(axis=0)

    if n_chunks == 1:
        out_ref[...] = chunk_sum(0)
    else:
        acc = jax.lax.fori_loop(
            0, n_chunks, lambda c, a: a + chunk_sum(c),
            jnp.zeros((SUBLANES, LANES), jnp.float32))
        out_ref[...] = acc


def _block_rows_for(rows_total, requested):
    """Static tile-row selection: multiple of 8 (256 when big), <= rows."""
    align = CHUNK_ROWS if rows_total >= CHUNK_ROWS else SUBLANES
    br = max(align, (requested // align) * align)
    br = min(br, (rows_total // align) * align)
    # v7x: on large inputs cap the tile so the 1-D "parallel" grid has enough
    # steps to split across both TensorCores, but never drop below the
    # HBM-roofline plateau tile (~1 MiB f32 per input).
    if rows_total >= 2 * PLATEAU_ROWS:
        split_cap = max(PLATEAU_ROWS,
                        min(MAX_ROWS, (rows_total // 16 // align) * align))
        br = min(br, split_cap)
    return br


def laplacian_aleatoric_uncertainty_loss(inp, target, log_variance,
                                         loss_weight: float = 1.0,
                                         block_rows: int = 4096,
                                         min_pallas_elements: int = 65536):
    # Flatten (matches torch .flatten()); keep native dtype (no HBM upcast).
    x = jnp.ravel(inp)
    t = jnp.ravel(target)
    lv = jnp.ravel(log_variance)
    n = x.shape[0]

    # Tiny inputs: a single fused XLA elementwise+reduce beats the pallas_call
    # prologue (and keeps the kernel's >=8-row invariant trivially satisfied).
    if n < max(min_pallas_elements, SUBLANES * LANES):
        xf, tf, lvf = (a.astype(jnp.float32) for a in (x, t, lv))
        loss = 1.4142 * jnp.exp(-lvf) * jnp.abs(xf - tf) + lvf
        return jnp.mean(loss) * jnp.float32(loss_weight)

    # Align only to 128 lanes (the reshape requirement).  n % 128 == 0 is the
    # zero-copy fast path; otherwise pad <=127 zeros (each contributes 0 loss).
    pad = (-n) % LANES
    rows_total = (n + pad) // LANES

    def prep(a):
        if pad:
            a = jnp.pad(a, (0, pad))
        return a.reshape(rows_total, LANES)

    x2, t2, lv2 = prep(x), prep(t), prep(lv)

    br = _block_rows_for(rows_total, block_rows)
    chunk_rows = min(CHUNK_ROWS, br)
    assert br % SUBLANES == 0 and br % chunk_rows == 0
    grid_n = pl.cdiv(rows_total, br)
    ragged = (rows_total % br) != 0

    kernel = functools.partial(_loss_partial_sum_kernel,
                               block_rows=br, chunk_rows=chunk_rows,
                               rows_total=rows_total, ragged=ragged)

    in_spec = pl.BlockSpec((br, LANES), lambda i: (i, 0))
    out_spec = pl.BlockSpec((SUBLANES, LANES), lambda i: (i, 0))

    bytes_in = sum(int(a.size) * a.dtype.itemsize for a in (x2, t2, lv2))
    bytes_out = grid_n * SUBLANES * LANES * 4

    partials = pl.pallas_call(
        kernel,
        out_shape=jax.ShapeDtypeStruct((grid_n * SUBLANES, LANES), jnp.float32),
        grid_spec=pltpu.PrefetchScalarGridSpec(
            num_scalar_prefetch=0,
            grid=(grid_n,),
            in_specs=[in_spec, in_spec, in_spec],
            out_specs=out_spec,
        ),
        compiler_params=pltpu.CompilerParams(
            dimension_semantics=("parallel",)),
        cost_estimate=pl.CostEstimate(
            flops=6 * rows_total * LANES,
            transcendentals=rows_total * LANES,
            bytes_accessed=bytes_in + bytes_out),
    )(x2, t2, lv2)

    # Tiny glue: tree-sum the per-block lane-dense partials, mean over the
    # ORIGINAL element count, scale by loss_weight.
    return (jnp.sum(partials) / jnp.float32(n)) * jnp.float32(loss_weight)


def _reference(inp, target, log_variance, loss_weight=1.0):
    x = jnp.ravel(inp).astype(jnp.float32)
    t = jnp.ravel(target).astype(jnp.float32)
    lv = jnp.ravel(log_variance).astype(jnp.float32)
    loss = 1.4142 * jnp.exp(-lv) * jnp.abs(x - t) + lv
    return jnp.mean(loss) * loss_weight


if __name__ == "__main__":
    key = jax.random.PRNGKey(0)
    k1, k2, k3 = jax.random.split(key, 3)

    # 1) NCHW-shaped inputs (as a depth-loss caller would pass).
    #    n=2048 -> rows_total=16, single block, single chunk.  Force the
    #    Pallas path (bypass the tiny-input JAX fallback) for the demo.
    shape = (2, 4, 16, 16)
    inp = jax.random.normal(k1, shape, dtype=jnp.float32)
    target = jax.random.normal(k2, shape, dtype=jnp.float32)
    log_variance = 0.5 * jax.random.normal(k3, shape, dtype=jnp.float32)

    out = laplacian_aleatoric_uncertainty_loss(inp, target, log_variance,
                                               loss_weight=1.0,
                                               min_pallas_elements=0)
    out = jax.block_until_ready(out)
    ref = _reference(inp, target, log_variance, 1.0)
    assert jnp.allclose(out, ref, rtol=1e-5, atol=1e-5), (out, ref)

    # 2) Non-128-aligned length: exercises the <=127-element pad and the
    #    ragged last-grid-block row mask (rows_total=21, br=16, grid_n=2).
    k4, k5, k6 = jax.random.split(k3, 3)
    shape2 = (2600,)
    inp2 = jax.random.normal(k4, shape2, dtype=jnp.float32)
    target2 = jax.random.normal(k5, shape2, dtype=jnp.float32)
    logv2 = 0.5 * jax.random.normal(k6, shape2, dtype=jnp.float32)
    out2 = laplacian_aleatoric_uncertainty_loss(inp2, target2, logv2,
                                                loss_weight=1.0,
                                                min_pallas_elements=0)
    out2 = jax.block_until_ready(out2)
    ref2 = _reference(inp2, target2, logv2, 1.0)
    assert jnp.allclose(out2, ref2, rtol=1e-5, atol=1e-5), (out2, ref2)

    # 3) Larger aligned input: exercises the default (no-fallback) path and the
    #    in-kernel fori_loop chunk accumulation (rows_total=512, 2 chunks).
    k7, k8, k9 = jax.random.split(k6, 3)
    shape3 = (2, 4, 64, 128)
    inp3 = jax.random.normal(k7, shape3, dtype=jnp.float32)
    target3 = jax.random.normal(k8, shape3, dtype=jnp.float32)
    logv3 = 0.5 * jax.random.normal(k9, shape3, dtype=jnp.float32)
    out3 = laplacian_aleatoric_uncertainty_loss(inp3, target3, logv3, 1.0)
    out3 = jax.block_until_ready(out3)
    ref3 = _reference(inp3, target3, logv3, 1.0)
    assert jnp.allclose(out3, ref3, rtol=1e-5, atol=1e-5), (out3, ref3)

    print("KERNEL_OK")
</pallas_src>

<mosaic_0001>
module attributes {stable_mosaic.version = 11 : i64} {
  func.func @_loss_partial_sum_kernel(%arg0: i32, %arg1: memref<16x128xf32, #tpu.memory_space<vmem>>, %arg2: memref<16x128xf32, #tpu.memory_space<vmem>>, %arg3: memref<16x128xf32, #tpu.memory_space<vmem>>, %arg4: memref<8x128xf32, #tpu.memory_space<vmem>>) attributes {dimension_semantics = [#tpu.dimension_semantics<parallel>], iteration_bounds = array<i64: 1>, scalar_prefetch = 0 : i64, scratch_operands = 0 : i64, tpu.core_type = #tpu.core_type<tc>, window_params = [{transform_indices = @transform_0, window_bounds = array<i64: 16, 128>}, {transform_indices = @transform_1, window_bounds = array<i64: 16, 128>}, {transform_indices = @transform_2, window_bounds = array<i64: 16, 128>}, {transform_indices = @transform_3, window_bounds = array<i64: 8, 128>}]} {
    %c0 = arith.constant 0 : index
    %c0_0 = arith.constant 0 : index
    %0 = vector.load %arg1[%c0, %c0_0] : memref<16x128xf32, #tpu.memory_space<vmem>>, vector<16x128xf32>
    %c0_1 = arith.constant 0 : index
    %c0_2 = arith.constant 0 : index
    %1 = vector.load %arg2[%c0_1, %c0_2] : memref<16x128xf32, #tpu.memory_space<vmem>>, vector<16x128xf32>
    %c0_3 = arith.constant 0 : index
    %c0_4 = arith.constant 0 : index
    %2 = vector.load %arg3[%c0_3, %c0_4] : memref<16x128xf32, #tpu.memory_space<vmem>>, vector<16x128xf32>
    %cst = arith.constant 0.000000e+00 : f32
    %3 = vector.broadcast %cst : f32 to vector<16x128xf32>
    %4 = arith.subf %3, %2 : vector<16x128xf32>
    %5 = math.exp %4 : vector<16x128xf32>
    %cst_5 = arith.constant 1.414200e+00 : f32
    %6 = vector.broadcast %cst_5 : f32 to vector<16x128xf32>
    %7 = arith.mulf %6, %5 : vector<16x128xf32>
    %8 = arith.subf %0, %1 : vector<16x128xf32>
    %9 = math.absf %8 : vector<16x128xf32>
    %10 = arith.mulf %7, %9 : vector<16x128xf32>
    %11 = arith.addf %10, %2 : vector<16x128xf32>
    %12 = vector.shape_cast %11 : vector<16x128xf32> to vector<2x8x128xf32>
    %cst_6 = arith.constant dense<0.000000e+00> : vector<8x128xf32>
    %13 = vector.multi_reduction <add>, %12, %cst_6 [0] : vector<2x8x128xf32> to vector<8x128xf32>
    %c0_7 = arith.constant 0 : index
    %c0_8 = arith.constant 0 : index
    %14 = vector.load %arg4[%c0_7, %c0_8] : memref<8x128xf32, #tpu.memory_space<vmem>>, vector<8x128xf32>
    tpu.vector_store %arg4[%c0_7, %c0_8], %13 {strides = array<i32>} : memref<8x128xf32, #tpu.memory_space<vmem>>, vector<8x128xf32>,
    return
  }
  func.func @transform_0(%arg0: i32) -> (i32, i32) {
    %c0_i32 = arith.constant 0 : i32
    %c0_i32_0 = arith.constant 0 : i32
    return %arg0, %c0_i32 : i32, i32
  }
  func.func @transform_1(%arg0: i32) -> (i32, i32) {
    %c0_i32 = arith.constant 0 : i32
    %c0_i32_0 = arith.constant 0 : i32
    return %arg0, %c0_i32 : i32, i32
  }
  func.func @transform_2(%arg0: i32) -> (i32, i32) {
    %c0_i32 = arith.constant 0 : i32
    %c0_i32_0 = arith.constant 0 : i32
    return %arg0, %c0_i32 : i32, i32
  }
  func.func @transform_3(%arg0: i32) -> (i32, i32) {
    %c0_i32 = arith.constant 0 : i32
    %c0_i32_0 = arith.constant 0 : i32
    return %arg0, %c0_i32 : i32, i32
  }
}

</mosaic_0001>

<bundles_post_ra>
// kernel: tpu_custom_call.1
= control target key start
LH: loop header
LB: loop body
LE: loop exit
PB: predicated region body
PF: predicated region fallthrough
CT: control target
= control target key end

     0   :  { %8 = vsyncpa [#allocation3], 0  ;;  %s290_s0 = inlined_call_operand.hbm [shape: f32[16,128], index: 0, kind: input, shape index: {}]   ;;  %s291_s1 = inlined_call_operand.hbm [shape: f32[16,128], index: 1, kind: input, shape index: {}]   ;;  %s292_s2 = inlined_call_operand.hbm [shape: f32[16,128], index: 2, kind: input, shape index: {}]   ;;  %s293_s3 = inlined_call_operand.hbm [shape: f32[8,128], index: 3, kind: output, shape index: {}]  }
   0x1   :  { %9 = vsyncpa [#allocation6], 0 }
   0x2   :  { %10 = vsyncpa [#allocation4], 0  ;;  %s200_s12 = smov [#allocation5]   ;;  %s201_s14 = smov [#allocation2]  }
   0x3   :  { %s28_s13 = sshll.u32 %s200_s12, 4  ;;  %s16_s15 = sshll.u32 %s201_s14, 4  ;;  %s29_s13 = int_to_ptr.vmem [resolvable:$true] %s28_s13  ;;  %s226_s15 = int_to_ptr.vmem [resolvable:$true] %s16_s15 }
   0x4   :  { %s106_s18 = scalar_lea.hbm %s291_s1, 256 }
   0x5   :  { %p107_p0 = scmp.ne.s32.totalorder %s291_s1, %s106_s18  ;;  %p110_p1 = scmp.lt.u32.totalorder %s106_s18, %s291_s1 }
   0x7   :  { %p112_p2 = pnand %p110_p1, %p107_p0 }
   0x9   :  { %115 = shalt.err (!%p112_p2)
}
   0xa   :  { %s116_s23 = scalar_lea.vmem %s29_s13, 256  ;;  %p121_p4 = scmp.lt.s32.totalorder %s29_s13, %s29_s13 }
   0xb   :  { %p117_p3 = scmp.ne.s32.totalorder %s29_s13, %s116_s23  ;;  %p122_p5 = scmp.lt.s32.totalorder %s116_s23, %s116_s23 }
   0xd   :  { %p123_p6 = por %p122_p5, %p121_p4 }
   0xf   :  { %p124_p7 = pnand %p123_p6, %p117_p3 }
  0x11   :  { %127 = shalt.err (!%p124_p7)
}
  0x12   :  { %s202_s24 = smov 128   ;;  %s203_s25 = smov 8  }
  0x13   :  { %34 = dma.hbm_to_vmem [thread:$0]  %s291_s1, 256, %s29_s13, [#allocation6], %s202_s24, %s202_s24, %s203_s25  }
  0x14   :  { %s128_s30 = scalar_lea.hbm %s290_s0, 256 }
  0x15   :  { %p129_p8 = scmp.ne.s32.totalorder %s290_s0, %s128_s30  ;;  %p132_p9 = scmp.lt.u32.totalorder %s128_s30, %s290_s0 }
  0x17   :  { %p134_p10 = pnand %p132_p9, %p129_p8 }
  0x19   :  { %137 = shalt.err (!%p134_p10)
}
  0x1a   :  { %s138_s8 = scalar_lea.vmem %s226_s15, 256  ;;  %p143_p12 = scmp.lt.s32.totalorder %s226_s15, %s226_s15 }
  0x1b   :  { %p139_p11 = scmp.ne.s32.totalorder %s226_s15, %s138_s8  ;;  %p144_p13 = scmp.lt.s32.totalorder %s138_s8, %s138_s8 }
  0x1d   :  { %p145_p0 = por %p144_p13, %p143_p12 }
  0x1f   :  { %p146_p1 = pnand %p145_p0, %p139_p11 }
  0x21   :  { %149 = shalt.err (!%p146_p1)
}
  0x22   :  { %22 = dma.hbm_to_vmem [thread:$0]  %s290_s0, 256, %s226_s15, [#allocation3], %s202_s24, %s202_s24, %s203_s25  }
  0x23   :  { %s204_s10 = smov [#allocation7]   ;;  %s150_s14 = scalar_lea.hbm %s292_s2, 256 }
  0x24   :  { %s40_s11 = sshll.u32 %s204_s10, 4  ;;  %p151_p2 = scmp.ne.s32.totalorder %s292_s2, %s150_s14  ;;  %s41_s11 = int_to_ptr.vmem [resolvable:$true] %s40_s11 }
  0x25   :  { %p154_p3 = scmp.lt.u32.totalorder %s150_s14, %s292_s2 }
  0x27   :  { %p156_p4 = pnand %p154_p3, %p151_p2 }
  0x29   :  { %159 = shalt.err (!%p156_p4)
}
  0x2a   :  { %s160_s20 = scalar_lea.vmem %s41_s11, 256  ;;  %p165_p6 = scmp.lt.s32.totalorder %s41_s11, %s41_s11 }
  0x2b   :  { %p161_p5 = scmp.ne.s32.totalorder %s41_s11, %s160_s20  ;;  %p166_p7 = scmp.lt.s32.totalorder %s160_s20, %s160_s20 }
  0x2d   :  { %p167_p8 = por %p166_p7, %p165_p6 }
  0x2f   :  { %p168_p9 = pnand %p167_p8, %p161_p5 }
  0x31   :  { %171 = shalt.err (!%p168_p9)
}
  0x32   :  { %46 = dma.hbm_to_vmem [thread:$0]  %s292_s2, 256, %s41_s11, [#allocation6], %s202_s24, %s202_s24, %s203_s25  }
  0x33   :  { %194 = dma.done.wait [#allocation3], 256  }
  0x34   :  { %195 = vsyncadd [#allocation3], 4294967040 }
  0x35   :  { %196 = dma.done.wait [#allocation6], 512  }
  0x36   :  { %197 = vsyncadd [#allocation6], 4294966784  ;;  %v60_v0 = vld [vmem:[#allocation7] sm:$0xff]  ;;  %v61_v1 = vld [vmem:[#allocation7 + $0x8] sm:$0xff]  ;;  %s205_s2 = smov [#allocation8]  }
  0x37   :  { %v62_v2 = vsub.f32 0.0, %v60_v0  ;;  %v63_v3 = vsub.f32 0.0, %v61_v1  ;;  %v56_v6 = vld [vmem:[#allocation2] sm:$0xff]  ;;  %v58_v7 = vld [vmem:[#allocation5] sm:$0xff]  ;;  %v57_v8 = vld [vmem:[#allocation2 + $0x8] sm:$0xff]  ;;  %s86_s21 = sshll.u32 %s205_s2, 4  ;;  %s87_s21 = int_to_ptr.vmem [resolvable:$true] %s86_s21 }
  0x38   :  { %v59_v9 = vld [vmem:[#allocation5 + $0x8] sm:$0xff]  ;;  %v70_v10 = vsub.f32 %v56_v6, %v58_v7  ;;  %s172_s22 = scalar_lea.vmem %s87_s21, 128  ;;  %p177_p11 = scmp.lt.s32.totalorder %s87_s21, %s87_s21 }
  0x39   :  { %v64_v4 = vmul.f32 1.442695, %v62_v2  ;;  %v66_v5 = vmul.f32 1.442695, %v63_v3  ;;  %v71_v11 = vsub.f32 %v57_v8, %v59_v9  ;;  %p173_p10 = scmp.ne.s32.totalorder %s87_s21, %s172_s22  ;;  %p178_p12 = scmp.lt.s32.totalorder %s172_s22, %s172_s22 }
  0x3a   :  { %v72_v12 = vand.u32 2147483647, %v70_v10 }
  0x3b   :  { %102 = vpow2.f32 %v64_v4  ;;  %v73_v14 = vand.u32 2147483647, %v71_v11  ;;  %p179_p13 = por %p178_p12, %p177_p11 }
  0x3c   :  { %104 = vpow2.f32 %v66_v5 }
  0x3d   :  { %p180_p0 = pnand %p179_p13, %p173_p10 }
  0x45   :  { %v103_v13 = vpop.eup %102 }
  0x46   :  { %v105_v15 = vpop.eup %104  ;;  %v68_v16 = vmul.f32 1.4142, %v103_v13 }
  0x47   :  { %v69_v17 = vmul.f32 1.4142, %v105_v15 }
  0x48   :  { %v74_v18 = vmul.f32 %v72_v12, %v68_v16 }
  0x49   :  { %v75_v19 = vmul.f32 %v73_v14, %v69_v17 }
  0x4a   :  { %v76_v20 = vadd.f32 %v74_v18, %v60_v0 }
  0x4b   :  { %v77_v21 = vadd.f32 %v75_v19, %v61_v1 }
  0x4d   :  { %v78_v22 = vadd.f32 %v77_v21, %v76_v20 }
  0x4f   :  { %79 = vst [vmem:[#allocation8] sm:$0xff] %v78_v22 }
  0x50   :  { %183 = shalt.err (!%p180_p0)
}
  0x51   :  { %s184_s25 = scalar_lea.hbm %s293_s3, 128 }
  0x52   :  { %p185_p1 = scmp.ne.s32.totalorder %s293_s3, %s184_s25  ;;  %p188_p2 = scmp.lt.u32.totalorder %s184_s25, %s293_s3 }
  0x54   :  { %p190_p3 = pnand %p188_p2, %p185_p1 }
  0x56   :  { %193 = shalt.err (!%p190_p3)
}
  0x57   :  { %89 = dma.vmem_to_hbm [thread:$0]  %s87_s21, 128, %s293_s3, [#allocation4]  }
  0x58   :  { %198 = dma.done.wait [#allocation4], 128  }
  0x59   :  { %199 = vsyncadd [#allocation4], 4294967168 }
  0x5a   :  { %93 = vsyncpa [#allocation3], 1 }
  0x5b   :  { %94 = vsyncpa [#allocation6], 1 }
  0x5c   :  { %95 = vsyncpa [#allocation4], 1 }

</bundles_post_ra>
